<compile_context>
chip_gen: v7x
topology: tpu7x:2x2x1
jax: 0.10.0
libtpu: 0.0.40
codegen_flags: <defaults>
</compile_context>

<pallas_src>
import functools
import math

import jax
import jax.numpy as jnp
from jax.experimental import pallas as pl
from jax.experimental.pallas import tpu as pltpu

NUM_HW_LAYERS = 2


# -----------------------------------------------------------------------------
# helpers
# -----------------------------------------------------------------------------
def _round_up(x, m):
    return ((x + m - 1) // m) * m


def _fit(dim, pref):
    """Return (tile, padded_dim): full-extent tile for small dims, else pref-tiled."""
    if dim <= pref:
        return dim, dim
    return pref, _round_up(dim, pref)


def _vmem_capacity_bytes():
    try:
        info = pltpu.get_tpu_info()
        cap = getattr(info, "vmem_capacity_bytes", None)
        if cap:
            return int(cap)
    except Exception:
        pass
    return 64 * 1024 * 1024  # v7x per-core physical VMEM (safe lower bound)


_VMEM_CAP = _vmem_capacity_bytes()
_VMEM_LIMIT = int(_VMEM_CAP * 0.80)
_VMEM_BUDGET = int(_VMEM_CAP * 0.50)


def _pick_time_tile(T, Bp, H, budget_bytes):
    """Largest time tile whose double-buffered gx/hs blocks fit the VMEM budget."""
    per_t = (2 * Bp * 4 * H + 2 * Bp * H) * 4                # gx + hs, dbl-buffered f32
    fixed = (2 * H * 4 * H * 2 +                             # whh bf16, dbl-buffered
             2 * Bp * 4 * H * 4 +                            # gate bias, dbl-buffered
             10 * Bp * H * 4)                                # h0/c0/hT/cT + scratch
    avail = max(budget_bytes - fixed, per_t)
    tt = int(max(1, min(T, avail // per_t, 32)))
    while T % tt:
        tt -= 1
    return tt


def _pad_rows(x, rows):
    return x if x.shape[0] == rows else jnp.pad(x, ((0, rows - x.shape[0]), (0, 0)))


def _prep_tm(x, Bp):
    """[B, T, E] batch-first -> [T, Bp, E] time-major, batch padded to Bp."""
    xt = jnp.transpose(x, (1, 0, 2))
    B = x.shape[0]
    if Bp != B:
        xt = jnp.pad(xt, ((0, 0), (0, Bp - B), (0, 0)))
    return xt


# -----------------------------------------------------------------------------
# Pallas kernels
# -----------------------------------------------------------------------------
def _matmul_kernel(x_ref, w_ref, b_ref, o_ref, acc_ref):
    """Tiled x @ w + b; bf16 MXU operands, f32 accumulation in VMEM scratch."""
    k = pl.program_id(2)

    @pl.when(k == 0)
    def _():
        acc_ref[...] = jnp.zeros_like(acc_ref)

    acc_ref[...] += jnp.dot(x_ref[...].astype(jnp.bfloat16),
                            w_ref[...].astype(jnp.bfloat16),
                            preferred_element_type=jnp.float32)

    @pl.when(k == pl.num_programs(2) - 1)
    def _():
        o_ref[...] = (acc_ref[...] + b_ref[...]).astype(o_ref.dtype)


def _highway_kernel(x_ref, w_ref, b_ref, o_ref):
    """2-layer Highway; one fused [Ecol, 3*Ecol] bf16 matmul per layer.

    Column segments [nonlinear | linear | gate] are each padded to Ecol (128-lane
    aligned), padded rows/cols are zero, so padded lanes stay exactly zero."""
    x = x_ref[...]                               # [tm, Ecol] f32
    ecol = x.shape[-1]
    for l in range(NUM_HW_LAYERS):               # static unroll
        y = jnp.dot(x.astype(jnp.bfloat16), w_ref[l],
                    preferred_element_type=jnp.float32) + b_ref[l]
        nonlin = jnp.maximum(y[:, :ecol], 0.0)
        lin = y[:, ecol:2 * ecol]
        gate = jax.nn.sigmoid(y[:, 2 * ecol:])
        x = gate * nonlin + (1.0 - gate) * lin
    o_ref[...] = x


def _lstm_rec_kernel(gx_ref, gb_ref, whh_ref, h0_ref, c0_ref, *refs, emit_hs):
    """LSTM recurrence over a block of Tt time steps per grid iteration.

    Grid = (S, T//Tt): S independent stacked recurrences ("parallel" axis,
    megacore-friendly), time is the inner "arbitrary" axis.
    gx_ref: [Tt, B, 4H] precomputed x@W_ih + b (lane-dense, gate order i,f,g,o).
    gb_ref: [B, 4H] per-batch gate bias (e.g. z @ W_z for the decoder, else 0).
    whh_ref: fused [H, 4H] bf16. State is carried in VMEM scratch."""
    if emit_hs:
        hs_ref, hT_ref, cT_ref, h_scr, c_scr = refs
    else:
        hs_ref = None
        hT_ref, cT_ref, h_scr, c_scr = refs

    t = pl.program_id(1)

    @pl.when(t == 0)
    def _():
        h_scr[...] = h0_ref[...]
        c_scr[...] = c0_ref[...]

    h = h_scr[...]
    c = c_scr[...]
    gb = gb_ref[...]
    w = whh_ref[...]                             # [H, 4H] bf16
    H = h.shape[-1]
    Tt = gx_ref.shape[0]
    for s in range(Tt):                          # static unroll within the block
        g = gx_ref[s] + gb + jnp.dot(h.astype(jnp.bfloat16), w,
                                     preferred_element_type=jnp.float32)
        i_g = jax.nn.sigmoid(g[:, 0 * H:1 * H])
        f_g = jax.nn.sigmoid(g[:, 1 * H:2 * H])
        g_g = jnp.tanh(g[:, 2 * H:3 * H])
        o_g = jax.nn.sigmoid(g[:, 3 * H:4 * H])
        c = f_g * c + i_g * g_g
        h = o_g * jnp.tanh(c)
        if emit_hs:
            hs_ref[s] = h

    h_scr[...] = h
    c_scr[...] = c

    @pl.when(t == pl.num_programs(1) - 1)
    def _():
        hT_ref[...] = h
        cT_ref[...] = c


def _vae_kernel(ctx_ref, wmu_ref, bmu_ref, wlv_ref, blv_ref, eps_ref,
                z_ref, mu_ref, lv_ref, kld_ref):
    """mu/logvar projections, reparameterization z = eps*std + mu, KLD mean."""
    ctx = ctx_ref[...]
    mu = jnp.dot(ctx, wmu_ref[...], preferred_element_type=jnp.float32) + bmu_ref[...]
    logvar = jnp.dot(ctx, wlv_ref[...], preferred_element_type=jnp.float32) + blv_ref[...]
    std = jnp.exp(0.5 * logvar)
    z_ref[...] = eps_ref[...] * std + mu
    mu_ref[...] = mu
    lv_ref[...] = logvar
    kld_b = -0.5 * jnp.sum(logvar - mu * mu - jnp.exp(logvar) + 1.0,
                           axis=1, keepdims=True)             # [B, 1]
    kld_ref[...] = jnp.mean(kld_b, axis=0, keepdims=True)     # [1, 1]


# -----------------------------------------------------------------------------
# Pallas wrappers
# -----------------------------------------------------------------------------
def pallas_linear(x, w, b=None, tm=256, tn=256, tk=512):
    """x [M, K] @ w [K, N] + b [1, N]; bf16 MXU, f32 K-accumulation."""
    M, K = x.shape
    _, N = w.shape
    if b is None:
        b = jnp.zeros((1, N), jnp.float32)
    b = b.reshape(1, N)

    tm_e, Mp = _fit(M, tm)
    tn_e, Np = _fit(N, tn)
    tk_e, Kp = _fit(K, tk)

    # Padding only triggers when a dim is larger than, and not a multiple of,
    # the tile; weights are stored pre-shaped at init so this is a no-op here.
    if Mp != M or Kp != K:
        x = jnp.pad(x, ((0, Mp - M), (0, Kp - K)))
    if Kp != K or Np != N:
        w = jnp.pad(w, ((0, Kp - K), (0, Np - N)))
    if Np != N:
        b = jnp.pad(b, ((0, 0), (0, Np - N)))

    out = pl.pallas_call(
        _matmul_kernel,
        out_shape=jax.ShapeDtypeStruct((Mp, Np), jnp.float32),
        grid_spec=pltpu.PrefetchScalarGridSpec(
            num_scalar_prefetch=0,
            grid=(Mp // tm_e, Np // tn_e, Kp // tk_e),
            in_specs=[
                pl.BlockSpec((tm_e, tk_e), lambda i, j, k: (i, k)),
                pl.BlockSpec((tk_e, tn_e), lambda i, j, k: (k, j)),
                pl.BlockSpec((1, tn_e), lambda i, j, k: (0, j)),
            ],
            out_specs=pl.BlockSpec((tm_e, tn_e), lambda i, j, k: (i, j)),
            scratch_shapes=[pltpu.VMEM((tm_e, tn_e), jnp.float32)],
        ),
        compiler_params=pltpu.CompilerParams(
            dimension_semantics=("parallel", "parallel", "arbitrary")),
    )(x, w, b)
    return out[:M, :N]


def highway_apply_tm(x_tm, hw, tm=512):
    """2-layer highway on time-major [T, Bp, E]; returns lane-padded [T, Bp, Ecol]."""
    T, Bp, E = x_tm.shape
    L, Ecol, _ = hw["w"].shape
    M = T * Bp
    x2 = x_tm.reshape(M, E)
    if Ecol != E:
        x2 = jnp.pad(x2, ((0, 0), (0, Ecol - E)))
    tm_e, Mp = _fit(M, tm)
    if Mp != M:
        x2 = jnp.pad(x2, ((0, Mp - M), (0, 0)))

    out = pl.pallas_call(
        _highway_kernel,
        out_shape=jax.ShapeDtypeStruct((Mp, Ecol), jnp.float32),
        grid_spec=pltpu.PrefetchScalarGridSpec(
            num_scalar_prefetch=0,
            grid=(Mp // tm_e,),
            in_specs=[
                pl.BlockSpec((tm_e, Ecol), lambda i: (i, 0)),
                pl.BlockSpec((L, Ecol, 3 * Ecol), lambda i: (0, 0, 0)),
                pl.BlockSpec((L, 1, 3 * Ecol), lambda i: (0, 0, 0)),
            ],
            out_specs=pl.BlockSpec((tm_e, Ecol), lambda i: (i, 0)),
        ),
        compiler_params=pltpu.CompilerParams(dimension_semantics=("parallel",)),
    )(x2, hw["w"], hw["b"])
    if Mp != M:
        out = out[:M]
    return out.reshape(T, Bp, Ecol)


def lstm_recurrence(gx, gb, whh, h0, c0, *, need_hs=True):
    """Stacked LSTM recurrences.

    gx: [S, T, Bp, 4H] precomputed gate inputs; gb: [S, Bp, 4H] gate bias;
    whh: [S, H, 4H] bf16; h0/c0: [S, Bp, H].  Returns (hs|None, hT, cT)."""
    S, T, Bp, H4 = gx.shape
    H = H4 // 4
    Tt = _pick_time_tile(T, Bp, H, _VMEM_BUDGET)

    # TODO(synk): constant-index inputs (whh/gb/h0/c0) could use
    # pipeline_mode=pl.Buffered(1) to drop their second VMEM buffer on v7x.
    in_specs = [
        pl.BlockSpec((None, Tt, Bp, H4), lambda s, t: (s, t, 0, 0)),
        pl.BlockSpec((None, Bp, H4), lambda s, t: (s, 0, 0)),
        pl.BlockSpec((None, H, H4), lambda s, t: (s, 0, 0)),
        pl.BlockSpec((None, Bp, H), lambda s, t: (s, 0, 0)),
        pl.BlockSpec((None, Bp, H), lambda s, t: (s, 0, 0)),
    ]
    out_shapes = []
    out_specs = []
    if need_hs:
        out_shapes.append(jax.ShapeDtypeStruct((S, T, Bp, H), jnp.float32))
        out_specs.append(pl.BlockSpec((None, Tt, Bp, H), lambda s, t: (s, t, 0, 0)))
    out_shapes.append(jax.ShapeDtypeStruct((S, Bp, H), jnp.float32))
    out_specs.append(pl.BlockSpec((None, Bp, H), lambda s, t: (s, 0, 0)))
    out_shapes.append(jax.ShapeDtypeStruct((S, Bp, H), jnp.float32))
    out_specs.append(pl.BlockSpec((None, Bp, H), lambda s, t: (s, 0, 0)))

    res = pl.pallas_call(
        functools.partial(_lstm_rec_kernel, emit_hs=need_hs),
        out_shape=tuple(out_shapes),
        grid_spec=pltpu.PrefetchScalarGridSpec(
            num_scalar_prefetch=0,
            grid=(S, T // Tt),
            in_specs=in_specs,
            out_specs=out_specs,
            scratch_shapes=[pltpu.VMEM((Bp, H), jnp.float32),
                            pltpu.VMEM((Bp, H), jnp.float32)],
        ),
        compiler_params=pltpu.CompilerParams(
            dimension_semantics=("parallel", "arbitrary"),
            vmem_limit_bytes=_VMEM_LIMIT),
    )(gx, gb, whh, h0, c0)

    if need_hs:
        hs, hT, cT = res
    else:
        hT, cT = res
        hs = None
    return hs, hT, cT


def _gate_inputs(hx_tm, wih, b):
    """[T, Bp, Ecol] highway output -> [T, Bp, 4H] gate pre-activations."""
    T, Bp, Ec = hx_tm.shape
    g = pallas_linear(hx_tm.reshape(T * Bp, Ec), wih, b)
    return g.reshape(T, Bp, wih.shape[1])


def vae_sample(ctx, wmu, bmu, wlv, blv, eps):
    B = ctx.shape[0]
    Z = wmu.shape[1]
    z, mu, lv, kld = pl.pallas_call(
        _vae_kernel,
        out_shape=(
            jax.ShapeDtypeStruct((B, Z), jnp.float32),
            jax.ShapeDtypeStruct((B, Z), jnp.float32),
            jax.ShapeDtypeStruct((B, Z), jnp.float32),
            jax.ShapeDtypeStruct((1, 1), jnp.float32),
        ),
    )(ctx, wmu, bmu, wlv, blv, eps)
    return z, mu, lv, kld[0, 0]


# -----------------------------------------------------------------------------
# Parameter init (deterministic, PyTorch-style uniform fan-in bounds).
# Weights are stored in their final compute layout (bf16, lane-padded, pre-split).
# -----------------------------------------------------------------------------
def _uniform(key, shape, bound):
    return jax.random.uniform(key, shape, jnp.float32, -bound, bound)


def _linear_init(key, fan_in, fan_out):
    kw, kb = jax.random.split(key)
    bound = 1.0 / math.sqrt(fan_in)
    return _uniform(kw, (fan_in, fan_out), bound), _uniform(kb, (1, fan_out), bound)


def _lstm_init(key, in_size, hidden, in_pad=None):
    k1, k2, k3, k4 = jax.random.split(key, 4)
    bound = 1.0 / math.sqrt(hidden)
    wih = _uniform(k1, (in_size, 4 * hidden), bound)
    if in_pad is not None and in_pad > in_size:
        wih = jnp.pad(wih, ((0, in_pad - in_size), (0, 0)))
    whh = _uniform(k2, (hidden, 4 * hidden), bound)           # fused, gate order i,f,g,o
    b = _uniform(k3, (1, 4 * hidden), bound) + _uniform(k4, (1, 4 * hidden), bound)
    return dict(wih=wih.astype(jnp.bfloat16), whh=whh.astype(jnp.bfloat16), b=b)


def _highway_init(key, size):
    ecol = _round_up(size, 128)
    ks = jax.random.split(key, 2 * NUM_HW_LAYERS)
    bound = 1.0 / math.sqrt(size)
    ws, bs = [], []
    for l in range(NUM_HW_LAYERS):
        w = _uniform(ks[2 * l], (size, 3 * size), bound)
        b = _uniform(ks[2 * l + 1], (1, 3 * size), bound)
        wp = jnp.zeros((ecol, 3 * ecol), jnp.float32)
        bp = jnp.zeros((1, 3 * ecol), jnp.float32)
        for seg in range(3):  # [nonlin | lin | gate] each lane-aligned to ecol
            wp = wp.at[:size, seg * ecol:seg * ecol + size].set(w[:, seg * size:(seg + 1) * size])
            bp = bp.at[:, seg * ecol:seg * ecol + size].set(b[:, seg * size:(seg + 1) * size])
        ws.append(wp)
        bs.append(bp)
    return dict(w=jnp.stack(ws).astype(jnp.bfloat16), b=jnp.stack(bs))


def init_paraphraser(key, cfg):
    E = cfg["word_embed_size"]
    He = cfg["encoder_rnn_size"]
    Hd = cfg["decoder_rnn_size"]
    Z = cfg["latent_variable_size"]
    V = cfg["vocab_size"]
    Ecol = _round_up(E, 128)
    keys = jax.random.split(key, 8)

    wmu, bmu = _linear_init(keys[3], 2 * He, Z)
    wlv, blv = _linear_init(keys[4], 2 * He, Z)
    wfc, bfc = _linear_init(keys[7], Hd, V)

    # decoder rnn: pre-split W_ih into x-rows (lane-padded to Ecol) and z-rows.
    ka, kb, kc, kd = jax.random.split(keys[6], 4)
    bound = 1.0 / math.sqrt(Hd)
    wih_full = _uniform(ka, (E + Z, 4 * Hd), bound)
    dec_rnn = dict(
        wih_x=jnp.pad(wih_full[:E], ((0, Ecol - E), (0, 0))).astype(jnp.bfloat16),
        wih_z=wih_full[E:].astype(jnp.bfloat16),
        whh=_uniform(kb, (Hd, 4 * Hd), bound).astype(jnp.bfloat16),
        b=_uniform(kc, (1, 4 * Hd), bound) + _uniform(kd, (1, 4 * Hd), bound),
    )

    return dict(
        cfg=cfg,
        hw=_highway_init(keys[0], E),
        enc_src=_lstm_init(keys[1], E, He, in_pad=Ecol),
        enc_tgt=_lstm_init(keys[2], E, He, in_pad=Ecol),
        wmu=wmu, bmu=bmu, wlv=wlv, blv=blv,
        dec_src=_lstm_init(keys[5], E, Hd, in_pad=Ecol),
        dec_rnn=dec_rnn,
        wfc=wfc.astype(jnp.bfloat16), bfc=bfc,
    )


# -----------------------------------------------------------------------------
# Paraphraser.forward equivalent
# -----------------------------------------------------------------------------
def paraphraser_forward(params, drop_prob, encoder_input=None, decoder_input=None,
                        z=None, initial_state=None, rng=None):
    cfg = params["cfg"]
    He = cfg["encoder_rnn_size"]
    Hd = cfg["decoder_rnn_size"]
    Z = cfg["latent_variable_size"]
    V = cfg["vocab_size"]
    hw = params["hw"]

    dec_src, dec_tgt = decoder_input
    B, T, _ = dec_tgt.shape
    Bp = _round_up(B, 8)                         # sublane-friendly batch

    need_enc = z is None
    need_init = initial_state is None
    kld = None
    h_s = c_s = None

    if need_enc:
        enc_src, enc_tgt = encoder_input
        hw_esrc = highway_apply_tm(_prep_tm(enc_src, Bp), hw)
        hw_etgt = highway_apply_tm(_prep_tm(enc_tgt, Bp), hw)
    if need_init:
        hw_dsrc = highway_apply_tm(_prep_tm(dec_src, Bp), hw)
    hw_dtgt = highway_apply_tm(_prep_tm(dec_tgt, Bp), hw)

    # Run the two independent recurrences (encoder-source, decoder-source-state)
    # on one stacked "parallel" axis so both TensorCores get work on v7x.
    fuse = (need_enc and need_init and He == Hd
            and enc_src.shape[1] == dec_src.shape[1])
    if fuse:
        gx = jnp.stack([
            _gate_inputs(hw_esrc, params["enc_src"]["wih"], params["enc_src"]["b"]),
            _gate_inputs(hw_dsrc, params["dec_src"]["wih"], params["dec_src"]["b"]),
        ])
        whh = jnp.stack([params["enc_src"]["whh"], params["dec_src"]["whh"]])
        z0 = jnp.zeros((2, Bp, He), jnp.float32)
        gb = jnp.zeros((2, Bp, 4 * He), jnp.float32)
        _, hT, cT = lstm_recurrence(gx, gb, whh, z0, z0, need_hs=False)
        h_s, c_s = hT[0], cT[0]
        initial_state = (hT[1], cT[1])
        need_init = False
    else:
        if need_enc:
            gx = _gate_inputs(hw_esrc, params["enc_src"]["wih"], params["enc_src"]["b"])[None]
            z0 = jnp.zeros((1, Bp, He), jnp.float32)
            gb = jnp.zeros((1, Bp, 4 * He), jnp.float32)
            _, hT, cT = lstm_recurrence(gx, gb, params["enc_src"]["whh"][None], z0, z0,
                                        need_hs=False)
            h_s, c_s = hT[0], cT[0]
        if need_init:
            gx = _gate_inputs(hw_dsrc, params["dec_src"]["wih"], params["dec_src"]["b"])[None]
            z0 = jnp.zeros((1, Bp, Hd), jnp.float32)
            gb = jnp.zeros((1, Bp, 4 * Hd), jnp.float32)
            _, hT, cT = lstm_recurrence(gx, gb, params["dec_src"]["whh"][None], z0, z0,
                                        need_hs=False)
            initial_state = (hT[0], cT[0])
            need_init = False

    if need_enc:
        gx = _gate_inputs(hw_etgt, params["enc_tgt"]["wih"], params["enc_tgt"]["b"])[None]
        gb = jnp.zeros((1, Bp, 4 * He), jnp.float32)
        _, hTt, _ = lstm_recurrence(gx, gb, params["enc_tgt"]["whh"][None],
                                    h_s[None], c_s[None], need_hs=False)
        ctx = jnp.concatenate([h_s[:B], hTt[0][:B]], axis=-1)        # [B, 2*He]
        rng, ekey = jax.random.split(rng)
        eps = jax.random.normal(ekey, (B, Z), jnp.float32)           # torch.randn analogue
        z, _, _, kld = vae_sample(ctx, params["wmu"], params["bmu"],
                                  params["wlv"], params["blv"], eps)

    # ----- decoder -----
    if drop_prob > 0.0:
        # TODO(synk): dropout mask generated with jax.random outside the kernel.
        rng, dkey = jax.random.split(rng)
        keep = 1.0 - drop_prob
        mask = jax.random.bernoulli(dkey, keep, hw_dtgt.shape).astype(jnp.float32)
        hw_dtgt = hw_dtgt * mask / keep

    # z conditioning folded into a per-batch gate bias added inside the kernel.
    gz = pallas_linear(z, params["dec_rnn"]["wih_z"], None)          # [B, 4*Hd]
    gz = _pad_rows(gz, Bp)
    h0 = _pad_rows(initial_state[0], Bp)
    c0 = _pad_rows(initial_state[1], Bp)

    gx = _gate_inputs(hw_dtgt, params["dec_rnn"]["wih_x"], params["dec_rnn"]["b"])[None]
    hs, hT, cT = lstm_recurrence(gx, gz[None], params["dec_rnn"]["whh"][None],
                                 h0[None], c0[None], need_hs=True)

    # logits computed time-major (no hs transpose), transposed once at the end.
    rnn_tm = hs[0][:, :B].reshape(T * B, Hd)
    logits_tm = pallas_linear(rnn_tm, params["wfc"], params["bfc"], tn=512)
    logits = jnp.transpose(logits_tm.reshape(T, B, V), (1, 0, 2))
    final_state = (hT[0][:B], cT[0][:B])
    return logits, final_state, kld


# -----------------------------------------------------------------------------
if __name__ == "__main__":
    cfg = dict(word_embed_size=32, encoder_rnn_size=32, decoder_rnn_size=32,
               latent_variable_size=16, vocab_size=64)
    B, T, E = 2, 8, cfg["word_embed_size"]

    key = jax.random.PRNGKey(0)
    pkey, dkey, rkey = jax.random.split(key, 3)
    params = init_paraphraser(pkey, cfg)

    k1, k2, k3, k4 = jax.random.split(dkey, 4)
    enc_src = jax.random.normal(k1, (B, T, E), jnp.float32)
    enc_tgt = jax.random.normal(k2, (B, T, E), jnp.float32)
    dec_src = jax.random.normal(k3, (B, T, E), jnp.float32)
    dec_tgt = jax.random.normal(k4, (B, T, E), jnp.float32)

    logits, (hT, cT), kld = paraphraser_forward(
        params, 0.0, (enc_src, enc_tgt), (dec_src, dec_tgt), z=None, rng=rkey)
    jax.block_until_ready((logits, hT, cT, kld))

    assert logits.shape == (B, T, cfg["vocab_size"])
    assert hT.shape == (B, cfg["decoder_rnn_size"])
    assert cT.shape == (B, cfg["decoder_rnn_size"])
    assert kld.shape == ()
    assert bool(jnp.isfinite(logits).all()) and bool(jnp.isfinite(kld))
    print("KERNEL_OK")
</pallas_src>

<mosaic_0001>
module attributes {stable_mosaic.version = 11 : i64} {
  func.func @_highway_kernel(%arg0: i32, %arg1: memref<64x128xf32, #tpu.memory_space<vmem>>, %arg2: memref<2x128x384xbf16, #tpu.memory_space<vmem>>, %arg3: memref<2x1x384xf32, #tpu.memory_space<vmem>>, %arg4: memref<64x128xf32, #tpu.memory_space<vmem>>) attributes {dimension_semantics = [#tpu.dimension_semantics<parallel>], iteration_bounds = array<i64: 1>, scalar_prefetch = 0 : i64, scratch_operands = 0 : i64, tpu.core_type = #tpu.core_type<tc>, window_params = [{transform_indices = @transform_0, window_bounds = array<i64: 64, 128>}, {pipeline_mode = #tpu.pipeline_mode<synchronous>, transform_indices = @transform_1, window_bounds = array<i64: 2, 128, 384>}, {pipeline_mode = #tpu.pipeline_mode<synchronous>, transform_indices = @transform_2, window_bounds = array<i64: 2, 1, 384>}, {transform_indices = @transform_3, window_bounds = array<i64: 64, 128>}]} {
    %c0 = arith.constant 0 : index
    %c0_0 = arith.constant 0 : index
    %0 = vector.load %arg1[%c0, %c0_0] : memref<64x128xf32, #tpu.memory_space<vmem>>, vector<64x128xf32>
    %1 = arith.truncf %0 : vector<64x128xf32> to vector<64x128xbf16>
    %c0_1 = arith.constant 0 : index
    %c0_2 = arith.constant 0 : index
    %c0_3 = arith.constant 0 : index
    %2 = vector.load %arg2[%c0_1, %c0_2, %c0_3] : memref<2x128x384xbf16, #tpu.memory_space<vmem>>, vector<1x128x384xbf16>
    %3 = vector.shape_cast %2 : vector<1x128x384xbf16> to vector<128x384xbf16>
    %cst = arith.constant dense<0.000000e+00> : vector<64x384xf32>
    %4 = tpu.matmul %1, %3, %cst {dimension_numbers = #tpu.dot_dimension_numbers<[1], [0], [0], [1], [0, 0, 1, 1], [], []>} : vector<64x128xbf16>, vector<128x384xbf16>, vector<64x384xf32> -> vector<64x384xf32>
    %c0_4 = arith.constant 0 : index
    %c0_5 = arith.constant 0 : index
    %c0_6 = arith.constant 0 : index
    %5 = vector.load %arg3[%c0_4, %c0_5, %c0_6] : memref<2x1x384xf32, #tpu.memory_space<vmem>>, vector<1x1x384xf32>
    %6 = vector.shape_cast %5 : vector<1x1x384xf32> to vector<1x384xf32>
    %7 = vector.broadcast %6 : vector<1x384xf32> to vector<64x384xf32>
    %8 = arith.addf %4, %7 : vector<64x384xf32>
    %9 = vector.extract_strided_slice %8 {offsets = [0, 0], sizes = [64, 128], strides = [1, 1]} : vector<64x384xf32> to vector<64x128xf32>
    %cst_7 = arith.constant 0.000000e+00 : f32
    %10 = vector.broadcast %cst_7 : f32 to vector<64x128xf32>
    %11 = arith.maximumf %9, %10 : vector<64x128xf32>
    %12 = vector.extract_strided_slice %8 {offsets = [0, 128], sizes = [64, 128], strides = [1, 1]} : vector<64x384xf32> to vector<64x128xf32>
    %13 = vector.extract_strided_slice %8 {offsets = [0, 256], sizes = [64, 128], strides = [1, 1]} : vector<64x384xf32> to vector<64x128xf32>
    %14 = arith.negf %13 : vector<64x128xf32>
    %15 = math.exp %14 : vector<64x128xf32>
    %cst_8 = arith.constant 1.000000e+00 : f32
    %16 = vector.broadcast %cst_8 : f32 to vector<64x128xf32>
    %17 = arith.addf %16, %15 : vector<64x128xf32>
    %18 = arith.divf %16, %17 : vector<64x128xf32>
    %19 = arith.mulf %18, %11 : vector<64x128xf32>
    %cst_9 = arith.constant 1.000000e+00 : f32
    %20 = vector.broadcast %cst_9 : f32 to vector<64x128xf32>
    %21 = arith.subf %20, %18 : vector<64x128xf32>
    %22 = arith.mulf %21, %12 : vector<64x128xf32>
    %23 = arith.addf %19, %22 : vector<64x128xf32>
    %24 = arith.truncf %23 : vector<64x128xf32> to vector<64x128xbf16>
    %c1 = arith.constant 1 : index
    %c0_10 = arith.constant 0 : index
    %c0_11 = arith.constant 0 : index
    %25 = vector.load %arg2[%c1, %c0_10, %c0_11] : memref<2x128x384xbf16, #tpu.memory_space<vmem>>, vector<1x128x384xbf16>
    %26 = vector.shape_cast %25 : vector<1x128x384xbf16> to vector<128x384xbf16>
    %cst_12 = arith.constant dense<0.000000e+00> : vector<64x384xf32>
    %27 = tpu.matmul %24, %26, %cst_12 {dimension_numbers = #tpu.dot_dimension_numbers<[1], [0], [0], [1], [0, 0, 1, 1], [], []>} : vector<64x128xbf16>, vector<128x384xbf16>, vector<64x384xf32> -> vector<64x384xf32>
    %c1_13 = arith.constant 1 : index
    %c0_14 = arith.constant 0 : index
    %c0_15 = arith.constant 0 : index
    %28 = vector.load %arg3[%c1_13, %c0_14, %c0_15] : memref<2x1x384xf32, #tpu.memory_space<vmem>>, vector<1x1x384xf32>
    %29 = vector.shape_cast %28 : vector<1x1x384xf32> to vector<1x384xf32>
    %30 = vector.broadcast %29 : vector<1x384xf32> to vector<64x384xf32>
    %31 = arith.addf %27, %30 : vector<64x384xf32>
    %32 = vector.extract_strided_slice %31 {offsets = [0, 0], sizes = [64, 128], strides = [1, 1]} : vector<64x384xf32> to vector<64x128xf32>
    %cst_16 = arith.constant 0.000000e+00 : f32
    %33 = vector.broadcast %cst_16 : f32 to vector<64x128xf32>
    %34 = arith.maximumf %32, %33 : vector<64x128xf32>
    %35 = vector.extract_strided_slice %31 {offsets = [0, 128], sizes = [64, 128], strides = [1, 1]} : vector<64x384xf32> to vector<64x128xf32>
    %36 = vector.extract_strided_slice %31 {offsets = [0, 256], sizes = [64, 128], strides = [1, 1]} : vector<64x384xf32> to vector<64x128xf32>
    %37 = arith.negf %36 : vector<64x128xf32>
    %38 = math.exp %37 : vector<64x128xf32>
    %cst_17 = arith.constant 1.000000e+00 : f32
    %39 = vector.broadcast %cst_17 : f32 to vector<64x128xf32>
    %40 = arith.addf %39, %38 : vector<64x128xf32>
    %41 = arith.divf %39, %40 : vector<64x128xf32>
    %42 = arith.mulf %41, %34 : vector<64x128xf32>
    %cst_18 = arith.constant 1.000000e+00 : f32
    %43 = vector.broadcast %cst_18 : f32 to vector<64x128xf32>
    %44 = arith.subf %43, %41 : vector<64x128xf32>
    %45 = arith.mulf %44, %35 : vector<64x128xf32>
    %46 = arith.addf %42, %45 : vector<64x128xf32>
    %c0_19 = arith.constant 0 : index
    %c0_20 = arith.constant 0 : index
    %47 = vector.load %arg4[%c0_19, %c0_20] : memref<64x128xf32, #tpu.memory_space<vmem>>, vector<64x128xf32>
    tpu.vector_store %arg4[%c0_19, %c0_20], %46 {strides = array<i32>} : memref<64x128xf32, #tpu.memory_space<vmem>>, vector<64x128xf32>,
    return
  }
  func.func @transform_0(%arg0: i32) -> (i32, i32) {
    %c0_i32 = arith.constant 0 : i32
    %c0_i32_0 = arith.constant 0 : i32
    return %arg0, %c0_i32 : i32, i32
  }
  func.func @transform_1(%arg0: i32) -> (i32, i32, i32) {
    %c0_i32 = arith.constant 0 : i32
    %c0_i32_0 = arith.constant 0 : i32
    %c0_i32_1 = arith.constant 0 : i32
    %c0_i32_2 = arith.constant 0 : i32
    return %c0_i32, %c0_i32_0, %c0_i32_1 : i32, i32, i32
  }
  func.func @transform_2(%arg0: i32) -> (i32, i32, i32) {
    %c0_i32 = arith.constant 0 : i32
    %c0_i32_0 = arith.constant 0 : i32
    %c0_i32_1 = arith.constant 0 : i32
    %c0_i32_2 = arith.constant 0 : i32
    return %c0_i32, %c0_i32_0, %c0_i32_1 : i32, i32, i32
  }
  func.func @transform_3(%arg0: i32) -> (i32, i32) {
    %c0_i32 = arith.constant 0 : i32
    %c0_i32_0 = arith.constant 0 : i32
    return %arg0, %c0_i32 : i32, i32
  }
}

</mosaic_0001>

<bundles_post_ra>
// kernel: tpu_custom_call.1
= control target key start
LH: loop header
LB: loop body
LE: loop exit
PB: predicated region body
PF: predicated region fallthrough
CT: control target
= control target key end

     0   :  { %8 = vsyncpa [#allocation3], 0  ;;  %s1407_s0 = inlined_call_operand.hbm [shape: f32[64,128], index: 0, kind: input, shape index: {}]   ;;  %s1408_s1 = inlined_call_operand.hbm [shape: bf16[2,128,384], index: 1, kind: input, shape index: {}]   ;;  %s1409_s2 = inlined_call_operand.vmem [shape: f32[2,1,384], index: 2, kind: input, shape index: {}]   ;;  %s1410_s3 = inlined_call_operand.hbm [shape: f32[64,128], index: 3, kind: output, shape index: {}]  }
   0x1   :  { %9 = vsyncpa [#allocation6], 0 }
   0x2   :  { %10 = vsyncpa [#allocation4], 0  ;;  %s1239_s12 = smov [#allocation2]   ;;  %s1167_s16 = scalar_lea.hbm %s1407_s0, 1024 }
   0x3   :  { %s16_s13 = sshll.u32 %s1239_s12, 4  ;;  %p1168_p0 = scmp.ne.s32.totalorder %s1407_s0, %s1167_s16  ;;  %s17_s13 = int_to_ptr.vmem [resolvable:$true] %s16_s13 }
   0x4   :  { %p1171_p1 = scmp.lt.u32.totalorder %s1167_s16, %s1407_s0 }
   0x6   :  { %p1173_p2 = pnand %p1171_p1, %p1168_p0 }
   0x8   :  { %1176 = shalt.err (!%p1173_p2)
}
   0x9   :  { %s1177_s21 = scalar_lea.vmem %s17_s13, 1024  ;;  %p1182_p4 = scmp.lt.s32.totalorder %s17_s13, %s17_s13 }
   0xa   :  { %p1178_p3 = scmp.ne.s32.totalorder %s17_s13, %s1177_s21  ;;  %p1183_p5 = scmp.lt.s32.totalorder %s1177_s21, %s1177_s21 }
   0xc   :  { %p1184_p6 = por %p1183_p5, %p1182_p4 }
   0xe   :  { %p1185_p7 = pnand %p1184_p6, %p1178_p3 }
  0x10   :  { %1188 = shalt.err (!%p1185_p7)
}
  0x11   :  { %s1240_s22 = smov 128   ;;  %s1241_s23 = smov 8  }
  0x12   :  { %22 = dma.hbm_to_vmem [thread:$0]  %s1407_s0, 1024, %s17_s13, [#allocation3], %s1240_s22, %s1240_s22, %s1241_s23  }
  0x13   :  { %s1242_s26 = smov [#allocation5]   ;;  %s1189_s30 = scalar_lea.hbm %s1408_s1, 6144 }
  0x14   :  { %s28_s27 = sshll.u32 %s1242_s26, 4  ;;  %p1190_p8 = scmp.ne.s32.totalorder %s1408_s1, %s1189_s30  ;;  %s29_s27 = int_to_ptr.vmem [resolvable:$true] %s28_s27 }
  0x15   :  { %p1193_p9 = scmp.lt.u32.totalorder %s1189_s30, %s1408_s1 }
  0x17   :  { %p1195_p10 = pnand %p1193_p9, %p1190_p8 }
  0x19   :  { %1198 = shalt.err (!%p1195_p10)
}
  0x1a   :  { %s1199_s8 = scalar_lea.vmem %s29_s27, 6144  ;;  %p1204_p12 = scmp.lt.s32.totalorder %s29_s27, %s29_s27 }
  0x1b   :  { %p1200_p11 = scmp.ne.s32.totalorder %s29_s27, %s1199_s8  ;;  %p1205_p13 = scmp.lt.s32.totalorder %s1199_s8, %s1199_s8 }
  0x1d   :  { %p1206_p0 = por %p1205_p13, %p1204_p12 }
  0x1f   :  { %p1207_p1 = pnand %p1206_p0, %p1200_p11 }
  0x21   :  { %1210 = shalt.err (!%p1207_p1)
}
  0x22   :  { %s1243_s0 = smov 192   ;;  %s1244_s9 = smov 12  }
  0x23   :  { %34 = dma.hbm_to_vmem [thread:$0]  %s1408_s1, 6144, %s29_s27, [#allocation6], %s1243_s0, %s1243_s0, %s1244_s9  }
  0x24   :  { %1233 = dma.done.wait [#allocation3], 1024  }
  0x25   :  { %1234 = vsyncadd [#allocation3], 4294966272 }
  0x26   :  { %1235 = dma.done.wait [#allocation6], 6144  }
  0x27   :  { %1236 = vsyncadd [#allocation6], 4294961152  ;;  %v1245_v0 = vmov 0   ;;  %v1039_v1 = vld [vmem:[#allocation5 + $0x8] ss:$12 sps:$4 sm:$0xff]   ;;  %v44_v16 = vld [vmem:[#allocation2] sm:$0xff]  ;;  %v90_v61 = vlaneseq }
  0x28   :  { %265 = vmatprep.mubr.bf16.mxu0 %v1245_v0  ;;  %v1040_v2 = vld [vmem:[#allocation5 + $0x20] ss:$12 sps:$4 sm:$0xff]   ;;  %983 = vmatprep.subr.bf16.mxu1 %v1039_v1  ;;  %v1041_v3 = vld [vmem:[#allocation5 + $0x4] ss:$12 sps:$4 sm:$0xff]   ;;  %v1045_v6 = vld [vmem:[#allocation5 + $0x1c] ss:$12 sps:$4 sm:$0xff]  }
  0x29   :  { %984 = vmatpush3.bf16.msra.mxu1 %v1039_v1  ;;  %v1043_v4 = vld [vmem:[#allocation5 + $0x38] ss:$12 sps:$4 sm:$0xff]   ;;  %233 = vmatprep.subr.bf16.mxu0 %v1041_v3  ;;  %v1044_v5 = vld [vmem:[#allocation5] ss:$12 sps:$4 sm:$0xff]   ;;  %v1047_v9 = vld [vmem:[#allocation5 + $0x50] ss:$12 sps:$4 sm:$0xff]  }
  0x2a   :  { %985 = vmatprep.subr.bf16.mxu1 %v1040_v2  ;;  %234 = vmatpush1.bf16.msra.mxu0 %v1044_v5  ;;  %v1048_v7 = vld [vmem:[#allocation5 + $0x18] ss:$12 sps:$4 sm:$0xff]   ;;  %v1049_v8 = vld [vmem:[#allocation5 + $0x34] ss:$12 sps:$4 sm:$0xff]   ;;  %v1052_v10 = vld [vmem:[#allocation5 + $0x30] ss:$12 sps:$4 sm:$0xff]  }
  0x2b   :  { %235 = vmatprep.subr.bf16.mxu0 %v1045_v6  ;;  %v1053_v11 = vld [vmem:[#allocation5 + $0x4c] ss:$12 sps:$4 sm:$0xff]   ;;  %v1051_v12 = vld [vmem:[#allocation5 + $0x68] ss:$12 sps:$4 sm:$0xff]   ;;  %v1057_v15 = vld [vmem:[#allocation5 + $0x64] ss:$12 sps:$4 sm:$0xff]  }
  0x2c   :  { %v1056_v13 = vld [vmem:[#allocation5 + $0x48] ss:$12 sps:$4 sm:$0xff]   ;;  %v1055_v14 = vld [vmem:[#allocation5 + $0x80] ss:$12 sps:$4 sm:$0xff]   ;;  %v1059_v21 = vld [vmem:[#allocation5 + $0x98] ss:$12 sps:$4 sm:$0xff]  }
  0x2d   :  { %986 = vmatpush3.bf16.msra.mxu1 %v1040_v2  ;;  %v45_v17 = vld [vmem:[#allocation2 + $0x8] sm:$0xff]  ;;  %v1064_v22 = vld [vmem:[#allocation5 + $0x78] ss:$12 sps:$4 sm:$0xff]   ;;  %v1065_v23 = vld [vmem:[#allocation5 + $0x94] ss:$12 sps:$4 sm:$0xff]   ;;  %v1299_v62 = vshrl.u32 %v90_v61, 7 }
  0x2e   :  { %987 = vmatprep.subr.bf16.mxu1 %v1043_v4  ;;  %236 = vmatpush1.bf16.msra.mxu0 %v1048_v7  ;;  %v52_v18 = vpack.c.bf16 %v45_v17, %v44_v16  ;;  %v1060_v19 = vld [vmem:[#allocation5 + $0x60] ss:$12 sps:$4 sm:$0xff]   ;;  %v1061_v20 = vld [vmem:[#allocation5 + $0x7c] ss:$12 sps:$4 sm:$0xff]   ;;  %v46_v26 = vld [vmem:[#allocation2 + $0x10] sm:$0xff] }
  0x2f   :  { %237 = vmatprep.subr.bf16.mxu0 %v1049_v8  ;;  %v1063_v24 = vld [vmem:[#allocation5 + $0xb0] ss:$12 sps:$4 sm:$0xff]   ;;  %v1068_v28 = vld [vmem:[#allocation5 + $0xac] ss:$12 sps:$4 sm:$0xff]   ;;  %v48_v29 = vld [vmem:[#allocation2 + $0x20] sm:$0xff]  ;;  %v100_v63 = vsub.s32 2, %v1299_v62 }
  0x30   :  { %999 = vmatprep.mubr.bf16.mxu1 %v52_v18  ;;  %v1067_v25 = vld [vmem:[#allocation5 + $0x90] ss:$12 sps:$4 sm:$0xff]   ;;  %v49_v30 = vld [vmem:[#allocation2 + $0x28] sm:$0xff]  ;;  %v1075_v41 = vld [vmem:[#allocation5 + $0xd8] ss:$12 sps:$4 sm:$0xff]  }
  0x31   :  { %988 = vmatpush3.bf16.msra.mxu1 %v1043_v4  ;;  %v47_v27 = vld [vmem:[#allocation2 + $0x18] sm:$0xff]  ;;  %v1070_v31 = vld [vmem:[#allocation5 + $0xa8] ss:$12 sps:$4 sm:$0xff]   ;;  %v54_v33 = vpack.c.bf16 %v49_v30, %v48_v29  ;;  %v1073_v37 = vld [vmem:[#allocation5 + $0xc4] ss:$12 sps:$4 sm:$0xff]  }
  0x32   :  { %989 = vmatprep.subr.bf16.mxu1 %v1047_v9  ;;  %238 = vmatpush1.bf16.msra.mxu0 %v1052_v10  ;;  %v53_v32 = vpack.c.bf16 %v47_v27, %v46_v26  ;;  %v50_v34 = vld [vmem:[#allocation2 + $0x30] sm:$0xff]  ;;  %v51_v35 = vld [vmem:[#allocation2 + $0x38] sm:$0xff]  ;;  %v1071_v38 = vld [vmem:[#allocation5 + $0xc0] ss:$12 sps:$4 sm:$0xff]  }
  0x33   :  { %239 = vmatprep.subr.bf16.mxu0 %v1053_v11  ;;  %v55_v36 = vpack.c.bf16 %v51_v35, %v50_v34  ;;  %v1074_v39 = vld [vmem:[#allocation5 + $0xc8] ss:$12 sps:$4 sm:$0xff]   ;;  %v1078_v42 = vld [vmem:[#allocation5 + $0xe0] ss:$12 sps:$4 sm:$0xff]   ;;  %v1079_v44 = vld [vmem:[#allocation5 + $0xf0] ss:$12 sps:$4 sm:$0xff]  }
  0x34   :  { %v1077_v40 = vld [vmem:[#allocation5 + $0xdc] ss:$12 sps:$4 sm:$0xff]   ;;  %v1081_v43 = vld [vmem:[#allocation5 + $0xf4] ss:$12 sps:$4 sm:$0xff]   ;;  %v1082_v45 = vld [vmem:[#allocation5 + $0xf8] ss:$12 sps:$4 sm:$0xff]  }
  0x35   :  { %990 = vmatpush3.bf16.msra.mxu1 %v1047_v9  ;;  %v1085_v46 = vld [vmem:[#allocation5 + $0x10c] ss:$12 sps:$4 sm:$0xff]   ;;  %v1083_v47 = vld [vmem:[#allocation5 + $0x108] ss:$12 sps:$4 sm:$0xff]   ;;  %v1086_v48 = vld [vmem:[#allocation5 + $0x110] ss:$12 sps:$4 sm:$0xff]  }
  0x36   :  { %991 = vmatprep.subr.bf16.mxu1 %v1051_v12  ;;  %240 = vmatpush1.bf16.msra.mxu0 %v1056_v13  ;;  %v1089_v49 = vld [vmem:[#allocation5 + $0x124] ss:$12 sps:$4 sm:$0xff]   ;;  %v1087_v50 = vld [vmem:[#allocation5 + $0x120] ss:$12 sps:$4 sm:$0xff]   ;;  %v1090_v51 = vld [vmem:[#allocation5 + $0x128] ss:$12 sps:$4 sm:$0xff]  }
  0x37   :  { %241 = vmatprep.subr.bf16.mxu0 %v1057_v15  ;;  %v1093_v52 = vld [vmem:[#allocation5 + $0x13c] ss:$12 sps:$4 sm:$0xff]   ;;  %v1091_v53 = vld [vmem:[#allocation5 + $0x138] ss:$12 sps:$4 sm:$0xff]   ;;  %v1094_v54 = vld [vmem:[#allocation5 + $0x140] ss:$12 sps:$4 sm:$0xff]  }
  0x38   :  { %v1097_v55 = vld [vmem:[#allocation5 + $0x154] ss:$12 sps:$4 sm:$0xff]   ;;  %v1095_v56 = vld [vmem:[#allocation5 + $0x150] ss:$12 sps:$4 sm:$0xff]   ;;  %v1098_v57 = vld [vmem:[#allocation5 + $0x158] ss:$12 sps:$4 sm:$0xff]  }
  0x39   :  { %992 = vmatpush3.bf16.msra.mxu1 %v1051_v12  ;;  %v1101_v58 = vld [vmem:[#allocation5 + $0x16c] ss:$12 sps:$4 sm:$0xff]   ;;  %v1099_v59 = vld [vmem:[#allocation5 + $0x168] ss:$12 sps:$4 sm:$0xff]   ;;  %v1102_v60 = vld [vmem:[#allocation5 + $0x170] ss:$12 sps:$4 sm:$0xff]  }
  0x3a   :  { %993 = vmatprep.subr.bf16.mxu1 %v1055_v14  ;;  %242 = vmatpush1.bf16.msra.mxu0 %v1060_v19  ;;  %v88_v1 = vld [vmem:[%s1409_s2] sm:$0x7] }
  0x3b   :  { %243 = vmatprep.subr.bf16.mxu0 %v1061_v20  ;;  %v101_v2 = vrot.slane %v88_v1, %v100_v63 }
  0x3d   :  { %994 = vmatpush3.bf16.msra.mxu1 %v1055_v14 }
  0x3e   :  { %995 = vmatprep.subr.bf16.mxu1 %v1059_v21  ;;  %244 = vmatpush1.bf16.msra.mxu0 %v1064_v22 }
  0x3f   :  { %245 = vmatprep.subr.bf16.mxu0 %v1065_v23 }
  0x41   :  { %996 = vmatpush3.bf16.msra.mxu1 %v1059_v21 }
  0x42   :  { %997 = vmatprep.subr.bf16.mxu1 %v1063_v24  ;;  %246 = vmatpush1.bf16.msra.mxu0 %v1067_v25 }
  0x43   :  { %247 = vmatprep.subr.bf16.mxu0 %v1068_v28 }
  0x45   :  { %998 = vmatpush3.bf16.msra.mxu1 %v1063_v24 }
  0x46   :  { %248 = vmatpush1.bf16.msra.mxu0 %v1070_v31  ;;  %1007 = vmatprep.subr.bf16.mxu1 %v1074_v39 }
  0x47   :  { %642 = vmatprep.subr.bf16.mxu0 %v1073_v37 }
  0x48   :  { %1000 = vmatmul.mubr.bf16.vlgmr.msra.gmra.mrb[0].mxu1 %v53_v32 }
  0x49   :  { %1003 = vmatprep.mubr.bf16.mxu1 %v54_v33  ;;  %266 = vmatmul.mubr.bf16.vlgmr.msra.gmra.mrb[0].mxu0 %v52_v18 }
  0x4a   :  { %275 = vmatprep.mubr.bf16.mxu0 %v1245_v0  ;;  %643 = vmatpush1.bf16.msra.mxu0 %v1071_v38 }
  0x4b   :  { %1008 = vmatpush3.bf16.msra.mxu1 %v1074_v39  ;;  %644 = vmatprep.subr.bf16.mxu0 %v1077_v40 }
  0x4c   :  { %1009 = vmatprep.subr.bf16.mxu1 %v1078_v42 }
  0x4e   :  { %645 = vmatpush1.bf16.msra.mxu0 %v1075_v41 }
  0x4f   :  { %1010 = vmatpush3.bf16.msra.mxu1 %v1078_v42  ;;  %646 = vmatprep.subr.bf16.mxu0 %v1081_v43  ;;  %v96_v43 = vsub.s32 1, %v1299_v62 }
  0x50   :  { %1004 = vmatmul.mubr.bf16.gmra.mrb[4].mxu1 %v55_v36  ;;  %1011 = vmatprep.subr.bf16.mxu1 %v1082_v45 }
  0x51   :  { %276 = vmatmul.mubr.bf16.gmra.mrb[4].mxu0 %v53_v32 }
  0x52   :  { %285 = vmatprep.mubr.bf16.mxu0 %v1245_v0  ;;  %647 = vmatpush1.bf16.msra.mxu0 %v1079_v44 }
  0x53   :  { %1012 = vmatpush3.bf16.msra.mxu1 %v1082_v45  ;;  %648 = vmatprep.subr.bf16.mxu0 %v1085_v46 }
  0x54   :  { %1013 = vmatprep.subr.bf16.mxu1 %v1086_v48 }
  0x56   :  { %649 = vmatpush1.bf16.msra.mxu0 %v1083_v47 }
  0x57   :  { %1014 = vmatpush3.bf16.msra.mxu1 %v1086_v48  ;;  %650 = vmatprep.subr.bf16.mxu0 %v1089_v49  ;;  %v1317_v49 = vrot.slane %v88_v1, %v96_v43 }
  0x58   :  { %1015 = vmatprep.subr.bf16.mxu1 %v1090_v51 }
  0x59   :  { %286 = vmatmul.mubr.bf16.gmra.mrb[8].mxu0 %v54_v33 }
  0x5a   :  { %295 = vmatprep.mubr.bf16.mxu0 %v1245_v0  ;;  %651 = vmatpush1.bf16.msra.mxu0 %v1087_v50 }
  0x5b   :  { %1016 = vmatpush3.bf16.msra.mxu1 %v1090_v51  ;;  %652 = vmatprep.subr.bf16.mxu0 %v1093_v52 }
  0x5c   :  { %1017 = vmatprep.subr.bf16.mxu1 %v1094_v54 }
  0x5e   :  { %653 = vmatpush1.bf16.msra.mxu0 %v1091_v53 }
  0x5f   :  { %1018 = vmatpush3.bf16.msra.mxu1 %v1094_v54  ;;  %654 = vmatprep.subr.bf16.mxu0 %v1097_v55 }
  0x60   :  { %1019 = vmatprep.subr.bf16.mxu1 %v1098_v57 }
  0x61   :  { %296 = vmatmul.mubr.bf16.gmra.mrb[12].mxu0 %v55_v36  ;;  %v92_v36 = vsub.s32 0, %v1299_v62 }
  0x62   :  { %674 = vmatprep.mubr.bf16.mxu0 %v1245_v0  ;;  %655 = vmatpush1.bf16.msra.mxu0 %v1095_v56 }
  0x63   :  { %1020 = vmatpush3.bf16.msra.mxu1 %v1098_v57  ;;  %656 = vmatprep.subr.bf16.mxu0 %v1101_v58  ;;  %v93_v45 = vrot.slane %v88_v1, %v92_v36 }
  0x64   :  { %1021 = vmatprep.subr.bf16.mxu1 %v1102_v60 }
  0x66   :  { %657 = vmatpush1.bf16.msra.mxu0 %v1099_v59 }
  0x67   :  { %1022 = vmatpush3.bf16.msra.mxu1 %v1102_v60 }
 0x11b   :  { %v1001_v3 = vpop.f32.mrb[0].mxu1 }
 0x11c   :  { %v349_v4 = vadd.f32 %v1001_v3, %v101_v2  ;;  %v340_v5 = vpop.f32.mrb[1].mxu1  ;;  %v267_v11 = vpop.f32.mrb[0].mxu0 }
 0x11d   :  { %v341_v6 = vadd.f32 %v340_v5, %v101_v2  ;;  %v1002_v7 = vpop.f32.mrb[2].mxu1  ;;  %v269_v14 = vpop.f32.mrb[1].mxu0  ;;  %v268_v52 = vadd.f32 %v267_v11, %v93_v45 }
 0x11e   :  { %v920_v8 = vmul.f32 -1.442695, %v349_v4  ;;  %v352_v9 = vadd.f32 %v1002_v7, %v101_v2  ;;  %v343_v10 = vpop.f32.mrb[3].mxu1  ;;  %v271_v16 = vpop.f32.mrb[2].mxu0  ;;  %v270_v60 = vadd.f32 %v269_v14, %v1317_v49 }
 0x11f   :  { %v918_v12 = vmul.f32 -1.442695, %v341_v6  ;;  %v344_v13 = vadd.f32 %v343_v10, %v101_v2  ;;  %v1307_v18 = vpop.f32.mrb[3].mxu0  ;;  %v371_v3 = vmax.f32 %v268_v52, 0.0 }
 0x120   :  { %1103 = vpow2.f32 %v920_v8  ;;  %v921_v15 = vmul.f32 -1.442695, %v352_v9  ;;  %v274_v7 = vadd.f32 %v1307_v18, %v1317_v49 }
 0x121   :  { %1105 = vpow2.f32 %v918_v12  ;;  %v919_v17 = vmul.f32 -1.442695, %v344_v13 }
 0x122   :  { %1107 = vpow2.f32 %v921_v15 }
 0x123   :  { %1109 = vpow2.f32 %v919_v17  ;;  %v1005_v19 = vpop.f32.mrb[4].mxu1 }
 0x124   :  { %v365_v20 = vadd.f32 %v1005_v19, %v101_v2  ;;  %v356_v21 = vpop.f32.mrb[5].mxu1  ;;  %v277_v27 = vpop.f32.mrb[4].mxu0 }
 0x125   :  { %v357_v22 = vadd.f32 %v356_v21, %v101_v2  ;;  %v1006_v23 = vpop.f32.mrb[6].mxu1  ;;  %v279_v30 = vpop.f32.mrb[5].mxu0  ;;  %v278_v53 = vadd.f32 %v277_v27, %v93_v45 }
 0x126   :  { %v924_v24 = vmul.f32 -1.442695, %v365_v20  ;;  %v368_v25 = vadd.f32 %v1006_v23, %v101_v2  ;;  %v359_v26 = vpop.f32.mrb[7].mxu1  ;;  %v281_v32 = vpop.f32.mrb[6].mxu0  ;;  %v280_v8 = vadd.f32 %v279_v30, %v1317_v49 }
 0x127   :  { %v922_v28 = vmul.f32 -1.442695, %v357_v22  ;;  %v360_v29 = vadd.f32 %v359_v26, %v101_v2  ;;  %v283_v34 = vpop.f32.mrb[7].mxu0  ;;  %v282_v56 = vadd.f32 %v281_v32, %v93_v45  ;;  %v272_v2 = vadd.f32 %v271_v16, %v93_v45 }
 0x128   :  { %1111 = vpow2.f32 %v924_v24  ;;  %v925_v31 = vmul.f32 -1.442695, %v368_v25  ;;  %v373_v4 = vmax.f32 %v278_v53, 0.0  ;;  %v284_v21 = vadd.f32 %v283_v34, %v1317_v49 }
 0x129   :  { %1113 = vpow2.f32 %v922_v28  ;;  %v923_v33 = vmul.f32 -1.442695, %v360_v29  ;;  %v374_v9 = vmax.f32 %v282_v56, 0.0  ;;  %v372_v20 = vmax.f32 %v272_v2, 0.0 }
 0x12a   :  { %v1104_v35 = vpop.eup %1103  ;;  %1115 = vpow2.f32 %v925_v31 }
 0x12b   :  { %v1106_v37 = vpop.eup %1105  ;;  %v405_v38 = vadd.f32 1.0, %v1104_v35  ;;  %1117 = vpow2.f32 %v923_v33 }
 0x12c   :  { %v1108_v39 = vpop.eup %1107  ;;  %v403_v40 = vadd.f32 1.0, %v1106_v37  ;;  %v287_v46 = vpop.f32.mrb[8].mxu0 }
 0x12d   :  { %v1110_v41 = vpop.eup %1109  ;;  %1119 = vrcp.f32 %v405_v38  ;;  %v406_v42 = vadd.f32 1.0, %v1108_v39  ;;  %v1313_v47 = vpop.f32.mrb[9].mxu0  ;;  %v288_v30 = vadd.f32 %v287_v46, %v93_v45 }
 0x12e   :  { %1121 = vrcp.f32 %v403_v40  ;;  %v404_v44 = vadd.f32 1.0, %v1110_v41  ;;  %v291_v48 = vpop.f32.mrb[10].mxu0  ;;  %v290_v53 = vadd.f32 %v1313_v47, %v1317_v49 }
 0x12f   :  { %1123 = vrcp.f32 %v406_v42  ;;  %v1319_v50 = vpop.f32.mrb[11].mxu0  ;;  %v292_v38 = vadd.f32 %v291_v48, %v93_v45 }
 0x130   :  { %1125 = vrcp.f32 %v404_v44  ;;  %v375_v44 = vmax.f32 %v288_v30, 0.0 }
 0x132   :  { %v1112_v51 = vpop.eup %1111 }
 0x133   :  { %v1114_v54 = vpop.eup %1113  ;;  %v409_v55 = vadd.f32 1.0, %v1112_v51 }
 0x134   :  { %v1116_v57 = vpop.eup %1115  ;;  %v407_v58 = vadd.f32 1.0, %v1114_v54  ;;  %v297_v5 = vpop.f32.mrb[12].mxu0 }
 0x135   :  { %v1118_v59 = vpop.eup %1117  ;;  %1127 = vrcp.f32 %v409_v55  ;;  %v410_v61 = vadd.f32 1.0, %v1116_v57  ;;  %v299_v10 = vpop.f32.mrb[13].mxu0  ;;  %v298_v14 = vadd.f32 %v297_v5, %v93_v45 }
 0x136   :  { %1129 = vrcp.f32 %v407_v58  ;;  %v408_v1 = vadd.f32 1.0, %v1118_v59  ;;  %v301_v15 = vpop.f32.mrb[14].mxu0  ;;  %v300_v40 = vadd.f32 %v299_v10, %v1317_v49  ;;  %v376_v59 = vmax.f32 %v292_v38, 0.0 }
 0x137   :  { %v1120_v6 = vpop.eup %1119  ;;  %1131 = vrcp.f32 %v410_v61  ;;  %v303_v22 = vpop.f32.mrb[15].mxu0  ;;  %v302_v26 = vadd.f32 %v301_v15, %v93_v45  ;;  %v377_v33 = vmax.f32 %v298_v14, 0.0 }
 0x138   :  { %v1122_v11 = vpop.eup %1121  ;;  %1133 = vrcp.f32 %v408_v1  ;;  %v429_v12 = vmul.f32 %v1120_v6, %v373_v4  ;;  %v437_v13 = vsub.f32 1.0, %v1120_v6  ;;  %v304_v61 = vadd.f32 %v303_v22, %v1317_v49 }
 0x139   :  { %v1124_v16 = vpop.eup %1123  ;;  %v427_v17 = vmul.f32 %v1122_v11, %v371_v3  ;;  %v435_v19 = vsub.f32 1.0, %v1122_v11  ;;  %v378_v34 = vmax.f32 %v302_v26, 0.0  ;;  %v294_v4 = vadd.f32 %v1319_v50, %v1317_v49  ;;  %v1338_v49 = vld [vmem:[%s1409_s2 + $0x3] sm:$0x7]  ;;  %s1246_s2 = smov [#allocation7]  }
 0x13a   :  { %v1126_v23 = vpop.eup %1125  ;;  %v445_v24 = vmul.f32 %v437_v13, %v280_v8  ;;  %v430_v18 = vmul.f32 %v1124_v16, %v374_v9  ;;  %v438_v25 = vsub.f32 1.0, %v1124_v16  ;;  %v1343_v50 = vrot.slane %v1338_v49, %v92_v36  ;;  %s881_s15 = sshll.u32 %s1246_s2, 4  ;;  %s882_s15 = int_to_ptr.vmem [resolvable:$true] %s881_s15 }
 0x13b   :  { %v443_v27 = vmul.f32 %v435_v19, %v270_v60  ;;  %v428_v28 = vmul.f32 %v1126_v23, %v372_v20  ;;  %v436_v29 = vsub.f32 1.0, %v1126_v23  ;;  %v510_v13 = vrot.slane %v1338_v49, %v100_v63  ;;  %s1211_s16 = scalar_lea.vmem %s882_s15, 1024  ;;  %p1216_p3 = scmp.lt.s32.totalorder %s882_s15, %s882_s15 }
 0x13c   :  { %v453_v31 = vadd.f32 %v445_v24, %v429_v12  ;;  %v446_v32 = vmul.f32 %v438_v25, %v284_v21  ;;  %p1212_p2 = scmp.ne.s32.totalorder %s882_s15, %s1211_s16  ;;  %p1217_p4 = scmp.lt.s32.totalorder %s1211_s16, %s1211_s16 }
 0x13d   :  { %v451_v35 = vadd.f32 %v443_v27, %v427_v17  ;;  %v444_v37 = vmul.f32 %v436_v29, %v274_v7 }
 0x13e   :  { %v454_v39 = vadd.f32 %v446_v32, %v430_v18  ;;  %p1218_p5 = por %p1217_p4, %p1216_p3 }
 0x13f   :  { %v1128_v41 = vpop.eup %1127  ;;  %v452_v42 = vadd.f32 %v444_v37, %v428_v28 }
 0x140   :  { %v1130_v51 = vpop.eup %1129  ;;  %v460_v52 = vpack.c.bf16 %v454_v39, %v453_v31  ;;  %v433_v54 = vmul.f32 %v1128_v41, %v377_v33  ;;  %v441_v46 = vsub.f32 1.0, %v1128_v41  ;;  %p1219_p6 = pnand %p1218_p5, %p1212_p2 }
 0x141   :  { %v1132_v55 = vpop.eup %1131  ;;  %v459_v56 = vpack.c.bf16 %v452_v42, %v451_v35  ;;  %v431_v57 = vmul.f32 %v1130_v51, %v375_v44  ;;  %v439_v58 = vsub.f32 1.0, %v1130_v51 }
 0x142   :  { %v1134_v45 = vpop.eup %1133  ;;  %v449_v48 = vmul.f32 %v441_v46, %v300_v40  ;;  %v434_v60 = vmul.f32 %v1132_v55, %v378_v34  ;;  %v442_v2 = vsub.f32 1.0, %v1132_v55 }
 0x143   :  { %v447_v3 = vmul.f32 %v439_v58, %v290_v53  ;;  %v432_v1 = vmul.f32 %v1134_v45, %v376_v59  ;;  %v440_v5 = vsub.f32 1.0, %v1134_v45  ;;  %675 = vmatmul.mubr.bf16.vlgmr.msra.gmra.mrb[16].mxu0 %v459_v56  ;;  %1023 = vmatprep.mubr.bf16.mxu1 %v459_v56 }
 0x144   :  { %v457_v47 = vadd.f32 %v449_v48, %v433_v54  ;;  %v450_v6 = vmul.f32 %v442_v2, %v304_v61  ;;  %1024 = vmatmul.mubr.bf16.vlgmr.msra.gmra.mrb[8].mxu1 %v460_v52  ;;  %684 = vmatprep.mubr.bf16.mxu0 %v1245_v0 }
 0x145   :  { %v455_v7 = vadd.f32 %v447_v3, %v431_v57  ;;  %v448_v8 = vmul.f32 %v440_v5, %v294_v4 }
 0x146   :  { %v458_v9 = vadd.f32 %v450_v6, %v434_v60 }
 0x147   :  { %v456_v10 = vadd.f32 %v448_v8, %v432_v1 }
 0x148   :  { %v462_v11 = vpack.c.bf16 %v458_v9, %v457_v47 }
 0x149   :  { %v461_v12 = vpack.c.bf16 %v456_v10, %v455_v7 }
 0x14b   :  { %685 = vmatmul.mubr.bf16.gmra.mrb[20].mxu0 %v460_v52  ;;  %1027 = vmatprep.mubr.bf16.mxu1 %v461_v12 }
 0x14c   :  { %1028 = vmatmul.mubr.bf16.gmra.mrb[12].mxu1 %v462_v11  ;;  %694 = vmatprep.mubr.bf16.mxu0 %v1245_v0 }
 0x153   :  { %695 = vmatmul.mubr.bf16.gmra.mrb[24].mxu0 %v461_v12 }
 0x154   :  { %704 = vmatprep.mubr.bf16.mxu0 %v1245_v0 }
 0x15b   :  { %705 = vmatmul.mubr.bf16.gmra.mrb[28].mxu0 %v462_v11 }
 0x216   :  { %v676_v14 = vpop.f32.mrb[16].mxu0 }
 0x217   :  { %v1349_v15 = vadd.f32 %v676_v14, %v1343_v50  ;;  %v1351_v0 = vpop.f32.mrb[17].mxu0  ;;  %v1025_v16 = vpop.f32.mrb[8].mxu1  ;;  %v506_v14 = vrot.slane %v1338_v49, %v96_v43 }
 0x218   :  { %v758_v17 = vadd.f32 %v1025_v16, %v510_v13  ;;  %v680_v19 = vpop.f32.mrb[18].mxu0  ;;  %v749_v20 = vpop.f32.mrb[9].mxu1 }
 0x219   :  { %v1354_v21 = vadd.f32 %v680_v19, %v1343_v50  ;;  %v750_v22 = vadd.f32 %v749_v20, %v510_v13  ;;  %v1356_v36 = vpop.f32.mrb[19].mxu0  ;;  %v1026_v23 = vpop.f32.mrb[10].mxu1  ;;  %v679_v49 = vadd.f32 %v1351_v0, %v506_v14 }
 0x21a   :  { %v953_v24 = vmul.f32 -1.442695, %v758_v17  ;;  %v761_v18 = vadd.f32 %v1026_v23, %v510_v13  ;;  %v752_v63 = vpop.f32.mrb[11].mxu1 }
 0x21b   :  { %v951_v25 = vmul.f32 -1.442695, %v750_v22  ;;  %v753_v26 = vadd.f32 %v752_v63, %v510_v13 }
 0x21c   :  { %1135 = vpow2.f32 %v953_v24  ;;  %v954_v27 = vmul.f32 -1.442695, %v761_v18  ;;  %v780_v24 = vmax.f32 %v1349_v15, 0.0 }
 0x21d   :  { %1137 = vpow2.f32 %v951_v25  ;;  %v952_v28 = vmul.f32 -1.442695, %v753_v26 }
 0x21e   :  { %1139 = vpow2.f32 %v954_v27  ;;  %v686_v29 = vpop.f32.mrb[20].mxu0 }
 0x21f   :  { %1141 = vpow2.f32 %v952_v28  ;;  %v1359_v30 = vadd.f32 %v686_v29, %v1343_v50  ;;  %v688_v31 = vpop.f32.mrb[21].mxu0  ;;  %v1029_v32 = vpop.f32.mrb[12].mxu1 }
 0x220   :  { %v774_v33 = vadd.f32 %v1029_v32, %v510_v13  ;;  %v690_v35 = vpop.f32.mrb[22].mxu0  ;;  %v765_v37 = vpop.f32.mrb[13].mxu1  ;;  %v689_v18 = vadd.f32 %v688_v31, %v506_v14 }
 0x221   :  { %v1362_v38 = vadd.f32 %v690_v35, %v1343_v50  ;;  %v766_v39 = vadd.f32 %v765_v37, %v510_v13  ;;  %v1364_v40 = vpop.f32.mrb[23].mxu0  ;;  %v1030_v34 = vpop.f32.mrb[14].mxu1  ;;  %v782_v20 = vmax.f32 %v1359_v30, 0.0  ;;  %v683_v35 = vadd.f32 %v1356_v36, %v506_v14 }
 0x222   :  { %v957_v41 = vmul.f32 -1.442695, %v774_v33  ;;  %v777_v42 = vadd.f32 %v1030_v34, %v510_v13  ;;  %v768_v44 = vpop.f32.mrb[15].mxu1  ;;  %v693_v15 = vadd.f32 %v1364_v40, %v506_v14 }
 0x223   :  { %v955_v51 = vmul.f32 -1.442695, %v766_v39  ;;  %v769_v52 = vadd.f32 %v768_v44, %v510_v13  ;;  %v783_v62 = vmax.f32 %v1362_v38, 0.0 }
 0x224   :  { %1143 = vpow2.f32 %v957_v41  ;;  %v958_v53 = vmul.f32 -1.442695, %v777_v42 }
 0x225   :  { %1145 = vpow2.f32 %v955_v51  ;;  %v956_v54 = vmul.f32 -1.442695, %v769_v52 }
 0x226   :  { %v1136_v46 = vpop.eup %1135  ;;  %1147 = vpow2.f32 %v958_v53  ;;  %v696_v55 = vpop.f32.mrb[24].mxu0 }
 0x227   :  { %v1138_v56 = vpop.eup %1137  ;;  %v814_v57 = vadd.f32 1.0, %v1136_v46  ;;  %1149 = vpow2.f32 %v956_v54  ;;  %v1367_v58 = vadd.f32 %v696_v55, %v1343_v50  ;;  %v1369_v59 = vpop.f32.mrb[25].mxu0 }
 0x228   :  { %v1140_v45 = vpop.eup %1139  ;;  %v812_v48 = vadd.f32 1.0, %v1138_v56  ;;  %v700_v60 = vpop.f32.mrb[26].mxu0 }
 0x229   :  { %v1142_v61 = vpop.eup %1141  ;;  %1151 = vrcp.f32 %v814_v57  ;;  %v815_v2 = vadd.f32 1.0, %v1140_v45  ;;  %v1372_v3 = vadd.f32 %v700_v60, %v1343_v50  ;;  %v1374_v1 = vpop.f32.mrb[27].mxu0  ;;  %v784_v52 = vmax.f32 %v1367_v58, 0.0 }
 0x22a   :  { %1153 = vrcp.f32 %v812_v48  ;;  %v813_v4 = vadd.f32 1.0, %v1142_v61  ;;  %v699_v57 = vadd.f32 %v1369_v59, %v506_v14 }
 0x22b   :  { %1155 = vrcp.f32 %v815_v2  ;;  %v785_v48 = vmax.f32 %v1372_v3, 0.0 }
 0x22c   :  { %1157 = vrcp.f32 %v813_v4 }
 0x22e   :  { %v1144_v5 = vpop.eup %1143  ;;  %v706_v47 = vpop.f32.mrb[28].mxu0 }
 0x22f   :  { %v1146_v6 = vpop.eup %1145  ;;  %v818_v7 = vadd.f32 1.0, %v1144_v5  ;;  %v707_v8 = vadd.f32 %v706_v47, %v1343_v50  ;;  %v708_v9 = vpop.f32.mrb[29].mxu0 }
 0x230   :  { %v1148_v10 = vpop.eup %1147  ;;  %v816_v11 = vadd.f32 1.0, %v1146_v6  ;;  %v710_v12 = vpop.f32.mrb[30].mxu0  ;;  %v709_v54 = vadd.f32 %v708_v9, %v506_v14  ;;  %v703_v6 = vadd.f32 %v1374_v1, %v506_v14 }
 0x231   :  { %v1150_v13 = vpop.eup %1149  ;;  %1159 = vrcp.f32 %v818_v7  ;;  %v819_v16 = vadd.f32 1.0, %v1148_v10  ;;  %v711_v17 = vadd.f32 %v710_v12, %v1343_v50  ;;  %v712_v19 = vpop.f32.mrb[31].mxu0  ;;  %v781_v50 = vmax.f32 %v1354_v21, 0.0 }
 0x232   :  { %1161 = vrcp.f32 %v816_v11  ;;  %v817_v22 = vadd.f32 1.0, %v1150_v13  ;;  %v786_v21 = vmax.f32 %v707_v8, 0.0  ;;  %v713_v4 = vadd.f32 %v712_v19, %v506_v14 }
 0x233   :  { %v1152_v23 = vpop.eup %1151  ;;  %1163 = vrcp.f32 %v819_v16  ;;  %v787_v36 = vmax.f32 %v711_v17, 0.0 }
 0x234   :  { %v1154_v63 = vpop.eup %1153  ;;  %v838_v25 = vmul.f32 %v1152_v23, %v782_v20  ;;  %v846_v26 = vsub.f32 1.0, %v1152_v23  ;;  %1165 = vrcp.f32 %v817_v22 }
 0x235   :  { %v1156_v43 = vpop.eup %1155  ;;  %v836_v27 = vmul.f32 %v1154_v63, %v780_v24  ;;  %v844_v28 = vsub.f32 1.0, %v1154_v63 }
 0x236   :  { %v1158_v29 = vpop.eup %1157  ;;  %v854_v30 = vmul.f32 %v846_v26, %v689_v18  ;;  %v839_v32 = vmul.f32 %v1156_v43, %v783_v62  ;;  %v847_v31 = vsub.f32 1.0, %v1156_v43 }
 0x237   :  { %v852_v33 = vmul.f32 %v844_v28, %v679_v49  ;;  %v837_v37 = vmul.f32 %v1158_v29, %v781_v50  ;;  %v845_v39 = vsub.f32 1.0, %v1158_v29 }
 0x238   :  { %v862_v38 = vadd.f32 %v854_v30, %v838_v25  ;;  %v855_v34 = vmul.f32 %v847_v31, %v693_v15 }
 0x239   :  { %v860_v41 = vadd.f32 %v852_v33, %v836_v27  ;;  %v853_v42 = vmul.f32 %v845_v39, %v683_v35 }
 0x23a   :  { %870 = vst [vmem:[#allocation7 + $0x10] sm:$0xff] %v862_v38  ;;  %v863_v0 = vadd.f32 %v855_v34, %v839_v32 }
 0x23b   :  { %v1160_v44 = vpop.eup %1159  ;;  %868 = vst [vmem:[#allocation7] sm:$0xff] %v860_v41  ;;  %v861_v51 = vadd.f32 %v853_v42, %v837_v37 }
 0x23c   :  { %v1162_v53 = vpop.eup %1161  ;;  %871 = vst [vmem:[#allocation7 + $0x18] sm:$0xff] %v863_v0  ;;  %v842_v40 = vmul.f32 %v1160_v44, %v786_v21  ;;  %v850_v46 = vsub.f32 1.0, %v1160_v44 }
 0x23d   :  { %v1164_v55 = vpop.eup %1163  ;;  %869 = vst [vmem:[#allocation7 + $0x8] sm:$0xff] %v861_v51  ;;  %v840_v56 = vmul.f32 %v1162_v53, %v784_v52  ;;  %v848_v45 = vsub.f32 1.0, %v1162_v53 }
 0x23e   :  { %v1166_v60 = vpop.eup %1165  ;;  %v858_v61 = vmul.f32 %v850_v46, %v709_v54  ;;  %v843_v2 = vmul.f32 %v1164_v55, %v787_v36  ;;  %v851_v5 = vsub.f32 1.0, %v1164_v55 }
 0x23f   :  { %v856_v58 = vmul.f32 %v848_v45, %v699_v57  ;;  %v841_v47 = vmul.f32 %v1166_v60, %v785_v48  ;;  %v849_v7 = vsub.f32 1.0, %v1166_v60 }
 0x240   :  { %v866_v8 = vadd.f32 %v858_v61, %v842_v40  ;;  %v859_v9 = vmul.f32 %v851_v5, %v713_v4 }
 0x241   :  { %v864_v10 = vadd.f32 %v856_v58, %v840_v56  ;;  %v857_v11 = vmul.f32 %v849_v7, %v703_v6 }
 0x242   :  { %874 = vst [vmem:[#allocation7 + $0x30] sm:$0xff] %v866_v8  ;;  %v867_v59 = vadd.f32 %v859_v9, %v843_v2 }
 0x243   :  { %872 = vst [vmem:[#allocation7 + $0x20] sm:$0xff] %v864_v10  ;;  %v865_v3 = vadd.f32 %v857_v11, %v841_v47 }
 0x244   :  { %875 = vst [vmem:[#allocation7 + $0x38] sm:$0xff] %v867_v59 }
 0x245   :  { %873 = vst [vmem:[#allocation7 + $0x28] sm:$0xff] %v865_v3 }
 0x246   :  { %1222 = shalt.err (!%p1219_p6)
}
 0x247   :  { %s1223_s19 = scalar_lea.hbm %s1410_s3, 1024 }
 0x248   :  { %p1224_p7 = scmp.ne.s32.totalorder %s1410_s3, %s1223_s19  ;;  %p1227_p8 = scmp.lt.u32.totalorder %s1223_s19, %s1410_s3 }
 0x24a   :  { %p1229_p9 = pnand %p1227_p8, %p1224_p7 }
 0x24c   :  { %1232 = shalt.err (!%p1229_p9)
}
 0x24d   :  { %887 = dma.vmem_to_hbm [thread:$0]  %s882_s15, 1024, %s1410_s3, [#allocation4], %s1240_s22, %s1240_s22, %s1241_s23  }
 0x24e   :  { %1237 = dma.done.wait [#allocation4], 1024  }
 0x24f   :  { %1238 = vsyncadd [#allocation4], 4294966272 }
 0x250   :  { %891 = vsyncpa [#allocation3], 1 }
 0x251   :  { %892 = vsyncpa [#allocation6], 1 }
 0x252   :  { %893 = vsyncpa [#allocation4], 1 }

</bundles_post_ra>
